<compile_context>
chip_gen: v7x
topology: tpu7x:2x2x1
jax: 0.10.0
libtpu: 0.0.40
codegen_flags: <defaults>
</compile_context>

<pallas_src>
import functools

import jax
import jax.numpy as jnp
from jax import lax
from jax.experimental import pallas as pl
from jax.experimental.pallas import tpu as pltpu

TEMPERATURE = 0.07
EPS = 1e-12  # matches torch.nn.functional.normalize eps


def _infonce_kernel(a_ref, tq_ref, tk_ref, out_ref,
                    a_norm_ref, l_row_ref, colsum_ref, acc_ref, *,
                    inv_temp, batch, block_k, text_resident):
    qi = pl.program_id(0)          # query (audio row) tile
    ki = pl.program_id(1)          # key   (text  row) tile — reduction axis (inner)
    nq = pl.num_programs(0)
    nk = pl.num_programs(1)

    # ---- init persistent accumulators at the very first grid step -------------
    @pl.when(jnp.logical_and(qi == 0, ki == 0))
    def _():
        colsum_ref[...] = jnp.zeros_like(colsum_ref)
        acc_ref[...] = jnp.zeros_like(acc_ref)

    # ---- once per query tile: reset row sums, normalize+scale queries, positives
    @pl.when(ki == 0)
    def _():
        l_row_ref[...] = jnp.zeros_like(l_row_ref)

        a = a_ref[...].astype(jnp.float32)                       # (tq, D)
        a_ssq = jnp.sum(a * a, axis=-1, keepdims=True)
        # sqrt(max(x, eps^2)) == max(sqrt(x), eps), so this matches F.normalize.
        a_scaled = a * (lax.rsqrt(jnp.maximum(a_ssq, EPS * EPS)) * inv_temp)
        a_norm_ref[...] = a_scaled                                # reused for all ki

        # Positive logits S[i,i] from the query-aligned text rows, in f32.
        tp = tq_ref[...].astype(jnp.float32)                      # (tq, D)
        tp_ssq = jnp.sum(tp * tp, axis=-1, keepdims=True)
        tp = tp * lax.rsqrt(jnp.maximum(tp_ssq, EPS * EPS))
        diag = jnp.sum(a_scaled * tp, axis=-1, keepdims=True)     # (tq, 1)
        # The diagonal is subtracted once per direction -> factor 2.
        acc_ref[...] = acc_ref[...] - 2.0 * jnp.sum(diag, keepdims=True)

    # ---- key tile (resident mode slices it straight out of VMEM) --------------
    if text_resident:
        k_start = pl.multiple_of(ki * block_k, block_k)
        t = tk_ref[pl.ds(k_start, block_k), :].astype(jnp.float32)   # (tk, D)
    else:
        t = tk_ref[...].astype(jnp.float32)                          # (tk, D)
    t_ssq = jnp.sum(t * t, axis=-1, keepdims=True)
    t = t * lax.rsqrt(jnp.maximum(t_ssq, EPS * EPS))

    # ---- logits tile on the MXU: bf16 operands, f32 accumulation --------------
    a_scaled = a_norm_ref[...]
    s = lax.dot_general(a_scaled.astype(jnp.bfloat16), t.astype(jnp.bfloat16),
                        (((1,), (1,)), ((), ())),
                        preferred_element_type=jnp.float32)          # (tq, tk)

    # |sim| <= 1  =>  s - 1/T in [-2/T, 0]: exp() stays finite and strictly
    # positive, so no online max / rescaling and a single exp feeds both LSEs.
    e = jnp.exp(s - inv_temp)
    l_row_ref[...] += jnp.sum(e, axis=1, keepdims=True)                       # (tq, 1)
    colsum_ref[ki] = colsum_ref[ki] + jnp.sum(e, axis=0, keepdims=True)       # (1, tk)

    # ---- finish the row LSE for this query tile -------------------------------
    @pl.when(ki == nk - 1)
    def _():
        lse_row = jnp.log(l_row_ref[...]) + inv_temp                          # (tq, 1)
        acc_ref[...] = acc_ref[...] + jnp.sum(lse_row, keepdims=True)

    # ---- final reduction: column LSE + scalar loss -----------------------------
    @pl.when(jnp.logical_and(qi == nq - 1, ki == nk - 1))
    def _():
        col_lse_sum = jnp.sum(jnp.log(colsum_ref[...])) + inv_temp * batch
        out_ref[...] = (acc_ref[...] + col_lse_sum) * (0.5 / batch)


def bidirectional_infonce_loss(audio_embeds, text_embeds, *,
                               temperature=TEMPERATURE,
                               block_q=None, block_k=None,
                               text_resident=None,
                               vmem_limit_bytes=None):
    assert audio_embeds.shape == text_embeds.shape
    assert audio_embeds.ndim == 2
    b, d = audio_embeds.shape
    inv_temp = 1.0 / float(temperature)
    # Constant-shift LSE needs exp(-2/temperature) to remain a normal f32 so every
    # row/column exp-sum is strictly positive.
    assert inv_temp < 40.0, "temperature too small for the shifted-LSE formulation"

    def _pick(cands):
        for c in cands:
            if b % c == 0:
                return c
        return b

    if block_q is None:
        # Big query tile -> high flops/byte when streaming key tiles from HBM.
        # (For very large d, pass a smaller block_q and/or vmem_limit_bytes.)
        block_q = _pick((512, 256, 128))
    if block_k is None:
        block_k = _pick((256, 128))
    assert b % block_q == 0 and b % block_k == 0, "batch must be divisible by the tiles"
    nq, nk = b // block_q, b // block_k

    itemsize = jnp.dtype(audio_embeds.dtype).itemsize
    if text_resident is None:
        # Keep the whole text matrix VMEM-resident (fetched from HBM exactly once)
        # whenever its (double-buffered) pipeline buffers stay comfortably small.
        text_resident = 2 * b * d * itemsize <= 8 * 1024 * 1024

    kernel = functools.partial(_infonce_kernel, inv_temp=inv_temp, batch=float(b),
                               block_k=block_k, text_resident=bool(text_resident))

    if text_resident:
        tk_spec = pl.BlockSpec((b, d), lambda qi, ki: (0, 0))          # DMA'd once
    else:
        tk_spec = pl.BlockSpec((block_k, d), lambda qi, ki: (ki, 0))   # streamed keys

    text_bytes = b * d * itemsize * (1 if text_resident else nq)
    cost = pl.CostEstimate(
        flops=2 * b * b * d,
        transcendentals=b * b + 3 * b,
        bytes_accessed=2 * b * d * itemsize + text_bytes + 4,
    )

    out = pl.pallas_call(
        kernel,
        out_shape=jax.ShapeDtypeStruct((1, 1), jnp.float32),
        grid=(nq, nk),
        in_specs=[
            pl.BlockSpec((block_q, d), lambda qi, ki: (qi, 0)),   # audio: query tiles
            pl.BlockSpec((block_q, d), lambda qi, ki: (qi, 0)),   # text rows for positives
            tk_spec,                                              # text: key tiles / resident
        ],
        out_specs=pl.BlockSpec((1, 1), lambda qi, ki: (0, 0)),
        scratch_shapes=[
            pltpu.VMEM((block_q, d), jnp.float32),      # cached normalized+scaled queries
            pltpu.VMEM((block_q, 1), jnp.float32),      # online row exp-sums
            pltpu.VMEM((nk, 1, block_k), jnp.float32),  # persistent column exp-sums
            pltpu.VMEM((1, 1), jnp.float32),            # scalar loss accumulator
        ],
        # Both axes are sequential: the column / scalar accumulators are shared
        # across query tiles (see the megacore TODO above).
        compiler_params=pltpu.CompilerParams(
            dimension_semantics=("arbitrary", "arbitrary"),
            vmem_limit_bytes=vmem_limit_bytes,
        ),
        cost_estimate=cost,
    )(audio_embeds, text_embeds, text_embeds)
    return out[0, 0]


# ----------------------------- references (for testing) -------------------------

def _reference_loss_f32(a, t, temperature=TEMPERATURE):
    """Exact f32 semantics of the PyTorch module."""
    a = a / jnp.maximum(jnp.linalg.norm(a, axis=-1, keepdims=True), EPS)
    t = t / jnp.maximum(jnp.linalg.norm(t, axis=-1, keepdims=True), EPS)
    s = (a @ t.T) / temperature
    diag = jnp.diag(s)
    l1 = jnp.mean(jax.scipy.special.logsumexp(s, axis=1) - diag)
    l2 = jnp.mean(jax.scipy.special.logsumexp(s, axis=0) - diag)
    return 0.5 * (l1 + l2)


def _reference_loss_bf16_matmul(a, t, temperature=TEMPERATURE):
    """Mirrors the kernel's dtype choices (bf16 MXU operands, f32 accumulation)."""
    inv_temp = 1.0 / temperature
    a = a.astype(jnp.float32)
    t = t.astype(jnp.float32)
    a_ssq = jnp.sum(a * a, axis=-1, keepdims=True)
    t_ssq = jnp.sum(t * t, axis=-1, keepdims=True)
    a = a * (lax.rsqrt(jnp.maximum(a_ssq, EPS * EPS)) * inv_temp)
    t = t * lax.rsqrt(jnp.maximum(t_ssq, EPS * EPS))
    s = lax.dot_general(a.astype(jnp.bfloat16), t.astype(jnp.bfloat16),
                        (((1,), (1,)), ((), ())),
                        preferred_element_type=jnp.float32)
    diag = jnp.sum(a * t, axis=-1)
    l1 = jnp.mean(jax.scipy.special.logsumexp(s, axis=1) - diag)
    l2 = jnp.mean(jax.scipy.special.logsumexp(s, axis=0) - diag)
    return 0.5 * (l1 + l2)


if __name__ == "__main__":
    key = jax.random.PRNGKey(0)
    k_a, k_t = jax.random.split(key)
    batch, hidden = 16, 32
    audio_embeds = jax.random.normal(k_a, (batch, hidden), dtype=jnp.float32)
    text_embeds = jax.random.normal(k_t, (batch, hidden), dtype=jnp.float32)

    ref_bf16 = _reference_loss_bf16_matmul(audio_embeds, text_embeds)
    ref_f32 = _reference_loss_f32(audio_embeds, text_embeds)

    # Exercise every code path at small shapes: single-tile, tiled resident text,
    # tiled streamed text, and asymmetric query/key tiles.
    variants = {
        "default_single_tile": dict(),
        "tiled_resident": dict(block_q=8, block_k=8, text_resident=True),
        "tiled_streamed": dict(block_q=8, block_k=8, text_resident=False),
        "asymmetric_streamed": dict(block_q=16, block_k=8, text_resident=False),
    }
    for name, kw in variants.items():
        loss = bidirectional_infonce_loss(audio_embeds, text_embeds, **kw)
        jax.block_until_ready(loss)
        # Tight check against a reference that uses the same bf16-matmul recipe.
        assert jnp.allclose(loss, ref_bf16, atol=5e-3, rtol=0.0), (name, loss, ref_bf16)
        # Loose check against the pure-f32 module semantics (bf16 MXU operands
        # introduce ~1e-2-level differences at these tiny shapes).
        assert jnp.allclose(loss, ref_f32, atol=5e-2, rtol=5e-2), (name, loss, ref_f32)

    print("KERNEL_OK")
</pallas_src>

<mosaic_0001>
module attributes {stable_mosaic.version = 11 : i64} {
  func.func @_infonce_kernel(%arg0: i32, %arg1: i32, %arg2: memref<16x32xf32, #tpu.memory_space<vmem>>, %arg3: memref<16x32xf32, #tpu.memory_space<vmem>>, %arg4: memref<16x32xf32, #tpu.memory_space<vmem>>, %arg5: memref<1x1xf32, #tpu.memory_space<vmem>>, %arg6: memref<16x32xf32, #tpu.memory_space<vmem>>, %arg7: memref<16x1xf32, #tpu.memory_space<vmem>>, %arg8: memref<1x1x16xf32, #tpu.memory_space<vmem>>, %arg9: memref<1x1xf32, #tpu.memory_space<vmem>>) attributes {dimension_semantics = [#tpu.dimension_semantics<arbitrary>, #tpu.dimension_semantics<arbitrary>], iteration_bounds = array<i64: 1, 1>, scalar_prefetch = 0 : i64, scratch_operands = 4 : i64, tpu.core_type = #tpu.core_type<tc>, window_params = [{transform_indices = @transform_0, window_bounds = array<i64: 16, 32>}, {transform_indices = @transform_1, window_bounds = array<i64: 16, 32>}, {pipeline_mode = #tpu.pipeline_mode<synchronous>, transform_indices = @transform_2, window_bounds = array<i64: 16, 32>}, {pipeline_mode = #tpu.pipeline_mode<synchronous>, transform_indices = @transform_3, window_bounds = array<i64: 1, 1>}]} {
    %c0_i32 = arith.constant 0 : i32
    %0 = arith.cmpi eq, %arg0, %c0_i32 : i32
    %c0_i32_0 = arith.constant 0 : i32
    %1 = arith.cmpi eq, %arg1, %c0_i32_0 : i32
    %2 = arith.andi %0, %1 : i1
    %3 = arith.extui %2 : i1 to i32
    %c0_i32_1 = arith.constant 0 : i32
    %4 = arith.cmpi ne, %3, %c0_i32_1 : i32
    scf.if %4 {
      %cst_24 = arith.constant 0.000000e+00 : f32
      %50 = vector.broadcast %cst_24 : f32 to vector<1x1x16xf32>
      %c0_25 = arith.constant 0 : index
      %c0_26 = arith.constant 0 : index
      %c0_27 = arith.constant 0 : index
      %51 = vector.load %arg8[%c0_25, %c0_26, %c0_27] : memref<1x1x16xf32, #tpu.memory_space<vmem>>, vector<1x1x16xf32>
      tpu.vector_store %arg8[%c0_25, %c0_26, %c0_27], %50 {strides = array<i32>} : memref<1x1x16xf32, #tpu.memory_space<vmem>>, vector<1x1x16xf32>,
      %cst_28 = arith.constant 0.000000e+00 : f32
      %52 = vector.broadcast %cst_28 : f32 to vector<1x1xf32>
      %c0_29 = arith.constant 0 : index
      %c0_30 = arith.constant 0 : index
      %53 = vector.load %arg9[%c0_29, %c0_30] : memref<1x1xf32, #tpu.memory_space<vmem>>, vector<1x1xf32>
      tpu.vector_store %arg9[%c0_29, %c0_30], %52 {strides = array<i32>} : memref<1x1xf32, #tpu.memory_space<vmem>>, vector<1x1xf32>,
    } else {
    }
    %c0_i32_2 = arith.constant 0 : i32
    %5 = arith.cmpi eq, %arg1, %c0_i32_2 : i32
    %6 = arith.extui %5 : i1 to i32
    %c0_i32_3 = arith.constant 0 : i32
    %7 = arith.cmpi ne, %6, %c0_i32_3 : i32
    scf.if %7 {
      %cst_24 = arith.constant 0.000000e+00 : f32
      %50 = vector.broadcast %cst_24 : f32 to vector<16x1xf32>
      %c0_25 = arith.constant 0 : index
      %c0_26 = arith.constant 0 : index
      %51 = vector.load %arg7[%c0_25, %c0_26] : memref<16x1xf32, #tpu.memory_space<vmem>>, vector<16x1xf32>
      tpu.vector_store %arg7[%c0_25, %c0_26], %50 {strides = array<i32>} : memref<16x1xf32, #tpu.memory_space<vmem>>, vector<16x1xf32>,
      %c0_27 = arith.constant 0 : index
      %c0_28 = arith.constant 0 : index
      %52 = vector.load %arg2[%c0_27, %c0_28] : memref<16x32xf32, #tpu.memory_space<vmem>>, vector<16x32xf32>
      %53 = arith.mulf %52, %52 : vector<16x32xf32>
      %cst_29 = arith.constant dense<0.000000e+00> : vector<16xf32>
      %54 = vector.multi_reduction <add>, %53, %cst_29 [1] : vector<16x32xf32> to vector<16xf32>
      %55 = vector.shape_cast %54 : vector<16xf32> to vector<16x1xf32>
      %cst_30 = arith.constant 1.000000e-24 : f32
      %56 = vector.broadcast %cst_30 : f32 to vector<16x1xf32>
      %57 = arith.maximumf %55, %56 : vector<16x1xf32>
      %58 = math.rsqrt %57 : vector<16x1xf32>
      %cst_31 = arith.constant 14.2857141 : f32
      %59 = vector.broadcast %cst_31 : f32 to vector<16x1xf32>
      %60 = arith.mulf %58, %59 : vector<16x1xf32>
      %61 = vector.broadcast %60 : vector<16x1xf32> to vector<16x32xf32>
      %62 = arith.mulf %52, %61 : vector<16x32xf32>
      %c0_32 = arith.constant 0 : index
      %c0_33 = arith.constant 0 : index
      %63 = vector.load %arg6[%c0_32, %c0_33] : memref<16x32xf32, #tpu.memory_space<vmem>>, vector<16x32xf32>
      tpu.vector_store %arg6[%c0_32, %c0_33], %62 {strides = array<i32>} : memref<16x32xf32, #tpu.memory_space<vmem>>, vector<16x32xf32>,
      %c0_34 = arith.constant 0 : index
      %c0_35 = arith.constant 0 : index
      %64 = vector.load %arg3[%c0_34, %c0_35] : memref<16x32xf32, #tpu.memory_space<vmem>>, vector<16x32xf32>
      %65 = arith.mulf %64, %64 : vector<16x32xf32>
      %cst_36 = arith.constant dense<0.000000e+00> : vector<16xf32>
      %66 = vector.multi_reduction <add>, %65, %cst_36 [1] : vector<16x32xf32> to vector<16xf32>
      %67 = vector.shape_cast %66 : vector<16xf32> to vector<16x1xf32>
      %cst_37 = arith.constant 1.000000e-24 : f32
      %68 = vector.broadcast %cst_37 : f32 to vector<16x1xf32>
      %69 = arith.maximumf %67, %68 : vector<16x1xf32>
      %70 = math.rsqrt %69 : vector<16x1xf32>
      %71 = vector.broadcast %70 : vector<16x1xf32> to vector<16x32xf32>
      %72 = arith.mulf %64, %71 : vector<16x32xf32>
      %73 = arith.mulf %62, %72 : vector<16x32xf32>
      %cst_38 = arith.constant dense<0.000000e+00> : vector<16xf32>
      %74 = vector.multi_reduction <add>, %73, %cst_38 [1] : vector<16x32xf32> to vector<16xf32>
      %75 = vector.shape_cast %74 : vector<16xf32> to vector<16x1xf32>
      %c0_39 = arith.constant 0 : index
      %c0_40 = arith.constant 0 : index
      %76 = vector.load %arg9[%c0_39, %c0_40] : memref<1x1xf32, #tpu.memory_space<vmem>>, vector<1x1xf32>
      %77 = vector.shape_cast %75 : vector<16x1xf32> to vector<1x16x1xf32>
      %cst_41 = arith.constant dense<0.000000e+00> : vector<1xf32>
      %78 = vector.multi_reduction <add>, %77, %cst_41 [1, 2] : vector<1x16x1xf32> to vector<1xf32>
      %79 = vector.shape_cast %78 : vector<1xf32> to vector<1x1x1xf32>
      %80 = vector.extract %79[0, 0, 0] : f32 from vector<1x1x1xf32>
      %81 = vector.broadcast %80 : f32 to vector<1x1xf32>
      %cst_42 = arith.constant 2.000000e+00 : f32
      %82 = vector.broadcast %cst_42 : f32 to vector<1x1xf32>
      %83 = arith.mulf %82, %81 : vector<1x1xf32>
      %84 = arith.subf %76, %83 : vector<1x1xf32>
      %c0_43 = arith.constant 0 : index
      %c0_44 = arith.constant 0 : index
      %85 = vector.load %arg9[%c0_43, %c0_44] : memref<1x1xf32, #tpu.memory_space<vmem>>, vector<1x1xf32>
      tpu.vector_store %arg9[%c0_43, %c0_44], %84 {strides = array<i32>} : memref<1x1xf32, #tpu.memory_space<vmem>>, vector<1x1xf32>,
    } else {
    }
    %c16_i32 = arith.constant 16 : i32
    %8 = arith.muli %arg1, %c16_i32 : i32
    %9 = tpu.assume_multiple %8, 16 : i32
    %10 = arith.index_cast %9 : i32 to index
    %c0 = arith.constant 0 : index
    %11 = vector.load %arg4[%10, %c0] : memref<16x32xf32, #tpu.memory_space<vmem>>, vector<16x32xf32>
    %12 = arith.mulf %11, %11 : vector<16x32xf32>
    %cst = arith.constant dense<0.000000e+00> : vector<16xf32>
    %13 = vector.multi_reduction <add>, %12, %cst [1] : vector<16x32xf32> to vector<16xf32>
    %14 = vector.shape_cast %13 : vector<16xf32> to vector<16x1xf32>
    %cst_4 = arith.constant 1.000000e-24 : f32
    %15 = vector.broadcast %cst_4 : f32 to vector<16x1xf32>
    %16 = arith.maximumf %14, %15 : vector<16x1xf32>
    %17 = math.rsqrt %16 : vector<16x1xf32>
    %18 = vector.broadcast %17 : vector<16x1xf32> to vector<16x32xf32>
    %19 = arith.mulf %11, %18 : vector<16x32xf32>
    %c0_5 = arith.constant 0 : index
    %c0_6 = arith.constant 0 : index
    %20 = vector.load %arg6[%c0_5, %c0_6] : memref<16x32xf32, #tpu.memory_space<vmem>>, vector<16x32xf32>
    %21 = arith.truncf %20 : vector<16x32xf32> to vector<16x32xbf16>
    %22 = arith.truncf %19 : vector<16x32xf32> to vector<16x32xbf16>
    %cst_7 = arith.constant dense<0.000000e+00> : vector<16x16xf32>
    %23 = tpu.matmul %21, %22, %cst_7 {dimension_numbers = #tpu.dot_dimension_numbers<[1], [1], [0], [0], [0, 0, 1, 0], [], []>} : vector<16x32xbf16>, vector<16x32xbf16>, vector<16x16xf32> -> vector<16x16xf32>
    %cst_8 = arith.constant 14.2857141 : f32
    %24 = vector.broadcast %cst_8 : f32 to vector<16x16xf32>
    %25 = arith.subf %23, %24 : vector<16x16xf32>
    %26 = math.exp %25 : vector<16x16xf32>
    %c0_9 = arith.constant 0 : index
    %c0_10 = arith.constant 0 : index
    %27 = vector.load %arg7[%c0_9, %c0_10] : memref<16x1xf32, #tpu.memory_space<vmem>>, vector<16x1xf32>
    %cst_11 = arith.constant dense<0.000000e+00> : vector<16xf32>
    %28 = vector.multi_reduction <add>, %26, %cst_11 [1] : vector<16x16xf32> to vector<16xf32>
    %29 = vector.shape_cast %28 : vector<16xf32> to vector<16x1xf32>
    %30 = arith.addf %27, %29 : vector<16x1xf32>
    %c0_12 = arith.constant 0 : index
    %c0_13 = arith.constant 0 : index
    %31 = vector.load %arg7[%c0_12, %c0_13] : memref<16x1xf32, #tpu.memory_space<vmem>>, vector<16x1xf32>
    tpu.vector_store %arg7[%c0_12, %c0_13], %30 {strides = array<i32>} : memref<16x1xf32, #tpu.memory_space<vmem>>, vector<16x1xf32>,
    %32 = arith.index_cast %arg1 : i32 to index
    %c0_14 = arith.constant 0 : index
    %c0_15 = arith.constant 0 : index
    %33 = vector.load %arg8[%32, %c0_14, %c0_15] : memref<1x1x16xf32, #tpu.memory_space<vmem>>, vector<1x1x16xf32>
    %34 = vector.shape_cast %33 : vector<1x1x16xf32> to vector<1x16xf32>
    %cst_16 = arith.constant dense<0.000000e+00> : vector<16xf32>
    %35 = vector.multi_reduction <add>, %26, %cst_16 [0] : vector<16x16xf32> to vector<16xf32>
    %36 = vector.shape_cast %35 : vector<16xf32> to vector<1x16xf32>
    %37 = arith.addf %34, %36 : vector<1x16xf32>
    %38 = arith.index_cast %arg1 : i32 to index
    %c0_17 = arith.constant 0 : index
    %c0_18 = arith.constant 0 : index
    %39 = vector.load %arg8[%38, %c0_17, %c0_18] : memref<1x1x16xf32, #tpu.memory_space<vmem>>, vector<1x1x16xf32>
    %40 = vector.shape_cast %39 : vector<1x1x16xf32> to vector<1x16xf32>
    %41 = vector.shape_cast %37 : vector<1x16xf32> to vector<1x1x16xf32>
    tpu.vector_store %arg8[%38, %c0_17, %c0_18], %41 {strides = array<i32>} : memref<1x1x16xf32, #tpu.memory_space<vmem>>, vector<1x1x16xf32>,
    %c0_i32_19 = arith.constant 0 : i32
    %42 = arith.cmpi eq, %arg1, %c0_i32_19 : i32
    %43 = arith.extui %42 : i1 to i32
    %c0_i32_20 = arith.constant 0 : i32
    %44 = arith.cmpi ne, %43, %c0_i32_20 : i32
    scf.if %44 {
      %c0_24 = arith.constant 0 : index
      %c0_25 = arith.constant 0 : index
      %50 = vector.load %arg7[%c0_24, %c0_25] : memref<16x1xf32, #tpu.memory_space<vmem>>, vector<16x1xf32>
      %51 = math.log %50 : vector<16x1xf32>
      %cst_26 = arith.constant 14.2857141 : f32
      %52 = vector.broadcast %cst_26 : f32 to vector<16x1xf32>
      %53 = arith.addf %51, %52 : vector<16x1xf32>
      %c0_27 = arith.constant 0 : index
      %c0_28 = arith.constant 0 : index
      %54 = vector.load %arg9[%c0_27, %c0_28] : memref<1x1xf32, #tpu.memory_space<vmem>>, vector<1x1xf32>
      %55 = vector.shape_cast %53 : vector<16x1xf32> to vector<1x16x1xf32>
      %cst_29 = arith.constant dense<0.000000e+00> : vector<1xf32>
      %56 = vector.multi_reduction <add>, %55, %cst_29 [1, 2] : vector<1x16x1xf32> to vector<1xf32>
      %57 = vector.shape_cast %56 : vector<1xf32> to vector<1x1x1xf32>
      %58 = vector.extract %57[0, 0, 0] : f32 from vector<1x1x1xf32>
      %59 = vector.broadcast %58 : f32 to vector<1x1xf32>
      %60 = arith.addf %54, %59 : vector<1x1xf32>
      %c0_30 = arith.constant 0 : index
      %c0_31 = arith.constant 0 : index
      %61 = vector.load %arg9[%c0_30, %c0_31] : memref<1x1xf32, #tpu.memory_space<vmem>>, vector<1x1xf32>
      tpu.vector_store %arg9[%c0_30, %c0_31], %60 {strides = array<i32>} : memref<1x1xf32, #tpu.memory_space<vmem>>, vector<1x1xf32>,
    } else {
    }
    %c0_i32_21 = arith.constant 0 : i32
    %45 = arith.cmpi eq, %arg0, %c0_i32_21 : i32
    %c0_i32_22 = arith.constant 0 : i32
    %46 = arith.cmpi eq, %arg1, %c0_i32_22 : i32
    %47 = arith.andi %45, %46 : i1
    %48 = arith.extui %47 : i1 to i32
    %c0_i32_23 = arith.constant 0 : i32
    %49 = arith.cmpi ne, %48, %c0_i32_23 : i32
    scf.if %49 {
      %c0_24 = arith.constant 0 : index
      %c0_25 = arith.constant 0 : index
      %c0_26 = arith.constant 0 : index
      %50 = vector.load %arg8[%c0_24, %c0_25, %c0_26] : memref<1x1x16xf32, #tpu.memory_space<vmem>>, vector<1x1x16xf32>
      %51 = math.log %50 : vector<1x1x16xf32>
      %52 = vector.shape_cast %51 : vector<1x1x16xf32> to vector<1x1x1x16xf32>
      %cst_27 = arith.constant dense<0.000000e+00> : vector<1xf32>
      %53 = vector.multi_reduction <add>, %52, %cst_27 [1, 2, 3] : vector<1x1x1x16xf32> to vector<1xf32>
      %54 = vector.shape_cast %53 : vector<1xf32> to vector<1x1x1x1xf32>
      %55 = vector.extract %54[0, 0, 0, 0] : f32 from vector<1x1x1x1xf32>
      %cst_28 = arith.constant 228.571426 : f32
      %56 = arith.addf %55, %cst_28 : f32
      %c0_29 = arith.constant 0 : index
      %c0_30 = arith.constant 0 : index
      %57 = vector.load %arg9[%c0_29, %c0_30] : memref<1x1xf32, #tpu.memory_space<vmem>>, vector<1x1xf32>
      %58 = vector.broadcast %56 : f32 to vector<1x1xf32>
      %59 = arith.addf %57, %58 : vector<1x1xf32>
      %cst_31 = arith.constant 3.125000e-02 : f32
      %60 = vector.broadcast %cst_31 : f32 to vector<1x1xf32>
      %61 = arith.mulf %59, %60 : vector<1x1xf32>
      %c0_32 = arith.constant 0 : index
      %c0_33 = arith.constant 0 : index
      %62 = vector.load %arg5[%c0_32, %c0_33] : memref<1x1xf32, #tpu.memory_space<vmem>>, vector<1x1xf32>
      tpu.vector_store %arg5[%c0_32, %c0_33], %61 {strides = array<i32>} : memref<1x1xf32, #tpu.memory_space<vmem>>, vector<1x1xf32>,
    } else {
    }
    return
  }
  func.func @transform_0(%arg0: i32, %arg1: i32) -> (i32, i32) {
    %c0_i32 = arith.constant 0 : i32
    %c0_i32_0 = arith.constant 0 : i32
    return %arg0, %c0_i32 : i32, i32
  }
  func.func @transform_1(%arg0: i32, %arg1: i32) -> (i32, i32) {
    %c0_i32 = arith.constant 0 : i32
    %c0_i32_0 = arith.constant 0 : i32
    return %arg0, %c0_i32 : i32, i32
  }
  func.func @transform_2(%arg0: i32, %arg1: i32) -> (i32, i32) {
    %c0_i32 = arith.constant 0 : i32
    %c0_i32_0 = arith.constant 0 : i32
    %c0_i32_1 = arith.constant 0 : i32
    return %c0_i32, %c0_i32_0 : i32, i32
  }
  func.func @transform_3(%arg0: i32, %arg1: i32) -> (i32, i32) {
    %c0_i32 = arith.constant 0 : i32
    %c0_i32_0 = arith.constant 0 : i32
    %c0_i32_1 = arith.constant 0 : i32
    return %c0_i32, %c0_i32_0 : i32, i32
  }
}

</mosaic_0001>

<bundles_post_ra>
// kernel: tpu_custom_call.1
= control target key start
LH: loop header
LB: loop body
LE: loop exit
PB: predicated region body
PF: predicated region fallthrough
CT: control target
= control target key end

     0   :  { %8 = vsyncpa [#allocation7], 0  ;;  %s579_s0 = inlined_call_operand.hbm [shape: f32[16,32], index: 0, kind: input, shape index: {}]   ;;  %s580_s1 = inlined_call_operand.hbm [shape: f32[16,32], index: 1, kind: input, shape index: {}]   ;;  %s581_s2 = inlined_call_operand.hbm [shape: f32[16,32], index: 2, kind: input, shape index: {}]   ;;  %s582_s3 = inlined_call_operand.hbm [shape: f32[1,1], index: 3, kind: output, shape index: {}]  }
   0x1   :  { %9 = vsyncpa [#allocation10], 0 }
   0x2   :  { %10 = vsyncpa [#allocation8], 0  ;;  %s444_s12 = smov [#allocation9]   ;;  %s445_s14 = smov [#allocation6]  }
   0x3   :  { %s28_s13 = sshll.u32 %s444_s12, 4  ;;  %s16_s15 = sshll.u32 %s445_s14, 4  ;;  %s29_s13 = int_to_ptr.vmem [resolvable:$true] %s28_s13  ;;  %s472_s15 = int_to_ptr.vmem [resolvable:$true] %s16_s15 }
   0x4   :  { %s350_s18 = scalar_lea.hbm %s580_s1, 256 }
   0x5   :  { %p351_p0 = scmp.ne.s32.totalorder %s580_s1, %s350_s18  ;;  %p354_p1 = scmp.lt.u32.totalorder %s350_s18, %s580_s1 }
   0x7   :  { %p356_p2 = pnand %p354_p1, %p351_p0 }
   0x9   :  { %359 = shalt.err (!%p356_p2)
}
   0xa   :  { %s360_s23 = scalar_lea.vmem %s29_s13, 256  ;;  %p365_p4 = scmp.lt.s32.totalorder %s29_s13, %s29_s13 }
   0xb   :  { %p361_p3 = scmp.ne.s32.totalorder %s29_s13, %s360_s23  ;;  %p366_p5 = scmp.lt.s32.totalorder %s360_s23, %s360_s23 }
   0xd   :  { %p367_p6 = por %p366_p5, %p365_p4 }
   0xf   :  { %p368_p7 = pnand %p367_p6, %p361_p3 }
  0x11   :  { %371 = shalt.err (!%p368_p7)
}
  0x12   :  { %s446_s24 = smov 128   ;;  %s447_s25 = smov 8  }
  0x13   :  { %34 = dma.hbm_to_vmem [thread:$0]  %s580_s1, 256, %s29_s13, [#allocation10], %s446_s24, %s446_s24, %s447_s25  }
  0x14   :  { %s372_s30 = scalar_lea.hbm %s579_s0, 256 }
  0x15   :  { %p373_p8 = scmp.ne.s32.totalorder %s579_s0, %s372_s30  ;;  %p376_p9 = scmp.lt.u32.totalorder %s372_s30, %s579_s0 }
  0x17   :  { %p378_p10 = pnand %p376_p9, %p373_p8 }
  0x19   :  { %381 = shalt.err (!%p378_p10)
}
  0x1a   :  { %s382_s8 = scalar_lea.vmem %s472_s15, 256  ;;  %p387_p12 = scmp.lt.s32.totalorder %s472_s15, %s472_s15 }
  0x1b   :  { %p383_p11 = scmp.ne.s32.totalorder %s472_s15, %s382_s8  ;;  %p388_p13 = scmp.lt.s32.totalorder %s382_s8, %s382_s8 }
  0x1d   :  { %p389_p0 = por %p388_p13, %p387_p12 }
  0x1f   :  { %p390_p1 = pnand %p389_p0, %p383_p11 }
  0x21   :  { %393 = shalt.err (!%p390_p1)
}
  0x22   :  { %22 = dma.hbm_to_vmem [thread:$0]  %s579_s0, 256, %s472_s15, [#allocation7], %s446_s24, %s446_s24, %s447_s25  }
  0x23   :  { %s448_s10 = smov [#allocation11]   ;;  %s394_s14 = scalar_lea.hbm %s581_s2, 256 }
  0x24   :  { %s40_s11 = sshll.u32 %s448_s10, 4  ;;  %p395_p2 = scmp.ne.s32.totalorder %s581_s2, %s394_s14  ;;  %s41_s11 = int_to_ptr.vmem [resolvable:$true] %s40_s11 }
  0x25   :  { %p398_p3 = scmp.lt.u32.totalorder %s394_s14, %s581_s2 }
  0x27   :  { %p400_p4 = pnand %p398_p3, %p395_p2 }
  0x29   :  { %403 = shalt.err (!%p400_p4)
}
  0x2a   :  { %s404_s20 = scalar_lea.vmem %s41_s11, 256  ;;  %p409_p6 = scmp.lt.s32.totalorder %s41_s11, %s41_s11 }
  0x2b   :  { %p405_p5 = scmp.ne.s32.totalorder %s41_s11, %s404_s20  ;;  %p410_p7 = scmp.lt.s32.totalorder %s404_s20, %s404_s20 }
  0x2d   :  { %p411_p8 = por %p410_p7, %p409_p6 }
  0x2f   :  { %p412_p9 = pnand %p411_p8, %p405_p5 }
  0x31   :  { %415 = shalt.err (!%p412_p9)
}
  0x32   :  { %46 = dma.hbm_to_vmem [thread:$0]  %s581_s2, 256, %s41_s11, [#allocation10], %s446_s24, %s446_s24, %s447_s25  }
  0x33   :  { %438 = dma.done.wait [#allocation7], 256  }
  0x34   :  { %439 = vsyncadd [#allocation7], 4294967040 }
  0x35   :  { %440 = dma.done.wait [#allocation10], 512  }
  0x36   :  { %441 = vsyncadd [#allocation10], 4294966784  ;;  %vm77_vm0 = vcmask 261120   ;;  %v138_v0 = vld [vmem:[#allocation11] sm:$0xff]  ;;  %v139_v2 = vld [vmem:[#allocation11 + $0x8] sm:$0xff]  ;;  %v449_v18 = vmov 0.0  }
  0x37   :  { %v73_v1 = vld [vmem:[#allocation6] sm:$0xff]  ;;  %v140_v3 = vmul.f32 %v138_v0, %v138_v0  ;;  %v141_v5 = vmul.f32 %v139_v2, %v139_v2  ;;  %v74_v6 = vld [vmem:[#allocation6 + $0x8] sm:$0xff]  ;;  %v524_v8 = vld [vmem:[#allocation9 + $0x8] sm:$0xff]  ;;  %308 = vmatprep.subr.bf16.mxu0 %v449_v18  ;;  %vm450_vm1 = vmmov 0   ;;  %vm63_vm2 = vcmask 122880   ;;  %s451_s24 = smov [#allocation12]  }
  0x38   :  { %v75_v4 = vmul.f32 %v73_v1, %v73_v1  ;;  %v76_v7 = vmul.f32 %v74_v6, %v74_v6  ;;  %v526_v9 = vld [vmem:[#allocation9] sm:$0xff]  ;;  %v97_v14 = vmul.f32 %v524_v8, %v524_v8  ;;  %310 = vmatprep.mubr.msk.bf16.mxu0 %vm450_vm1, %v449_v18  ;;  %64 = vst.msk [vmem:[#allocation4] sm:$0x1] %vm63_vm2, %v449_v18  ;;  %vm70_vm3 = vcmask 7168   ;;  %s293_s25 = sshll.u32 %s451_s24, 4  ;;  %s294_s25 = int_to_ptr.vmem [resolvable:$true] %s293_s25 }
  0x39   :  { %v143_v10 = vsel %vm77_vm0, %v140_v3, 0.0  ;;  %v146_v12 = vsel %vm77_vm0, %v141_v5, 0.0  ;;  %v96_v15 = vmul.f32 %v526_v9, %v526_v9  ;;  %71 = vst.msk [vmem:[#allocation3] sm:$0xff] %vm70_vm3, %v449_v18  ;;  %72 = vst.msk [vmem:[#allocation3 + $0x8] sm:$0xff] %vm70_vm3, %v449_v18  ;;  %vm214_vm4 = vcmask 130048   ;;  %s416_s26 = scalar_lea.vmem %s294_s25, 16  ;;  %p421_p11 = scmp.lt.s32.totalorder %s294_s25, %s294_s25 }
  0x3a   :  { %v78_v11 = vsel %vm77_vm0, %v75_v4, 0.0  ;;  %144 = vadd.xlane.f32.xlu1 %v143_v10  ;;  %v81_v13 = vsel %vm77_vm0, %v76_v7, 0.0  ;;  %v101_v16 = vsel %vm77_vm0, %v97_v14, 0.0  ;;  %vm65_vm5 = vcmask 0   ;;  %p417_p10 = scmp.ne.s32.totalorder %s294_s25, %s416_s26  ;;  %s420_s27 = scalar_lea.vmem %s294_s25, 32 }
  0x3b   :  { %79 = vadd.xlane.f32.xlu0 %v78_v11  ;;  %v98_v17 = vsel %vm77_vm0, %v96_v15, 0.0  ;;  %66 = vst.msk [vmem:[#allocation5] sm:$0x1] %vm65_vm5, %v449_v18  ;;  %p422_p12 = scmp.lt.s32.totalorder %s420_s27, %s416_s26 }
  0x3d   :  { %p423_p13 = por %p422_p12, %p421_p11 }
  0x3e   :  { %147 = vadd.xlane.f32.xlu1 %v146_v12 }
  0x3f   :  { %82 = vadd.xlane.f32.xlu0 %v81_v13  ;;  %p424_p0 = pnand %p423_p13, %p417_p10 }
  0x40   :  { %v212_v12 = vld [vmem:[#allocation3] sm:$0xff]  ;;  %v213_v14 = vld [vmem:[#allocation3 + $0x8] sm:$0xff] }
  0x42   :  { %102 = vadd.xlane.f32.xlu1 %v101_v16 }
  0x43   :  { %99 = vadd.xlane.f32.xlu0 %v98_v17 }
  0xc7   :  { %v145_v19 = vpop.xlane.xlu1 %144 }
  0xc8   :  { %v80_v20 = vpop.xlane.xlu0 %79  ;;  %v149_v21 = vmax.f32 %v145_v19, 1e-24 }
  0xc9   :  { %v84_v22 = vmax.f32 %v80_v20, 1e-24 }
  0xcb   :  { %328 = vrsqrt.f32 %v84_v22  ;;  %v148_v23 = vpop.xlane.xlu1 %147 }
  0xcc   :  { %v83_v24 = vpop.xlane.xlu0 %82  ;;  %330 = vrsqrt.f32 %v149_v21  ;;  %v150_v25 = vmax.f32 %v148_v23, 1e-24 }
  0xcd   :  { %v85_v26 = vmax.f32 %v83_v24, 1e-24 }
  0xce   :  { %332 = vrsqrt.f32 %v150_v25 }
  0xcf   :  { %334 = vrsqrt.f32 %v85_v26  ;;  %v103_v43 = vpop.xlane.xlu1 %102 }
  0xd0   :  { %v100_v42 = vpop.xlane.xlu0 %99  ;;  %v105_v45 = vmax.f32 %v103_v43, 1e-24 }
  0xd1   :  { %v104_v44 = vmax.f32 %v100_v42, 1e-24 }
  0xd3   :  { %336 = vrsqrt.f32 %v104_v44 }
  0xd4   :  { %338 = vrsqrt.f32 %v105_v45 }
  0xd5   :  { %v329_v27 = vpop.eup %328 }
  0xd6   :  { %v331_v28 = vpop.eup %330  ;;  %v88_v29 = vmul.f32 14.285714, %v329_v27 }
  0xd7   :  { %v153_v33 = vmul.f32 %v331_v28, %v138_v0 }
  0xd8   :  { %v333_v30 = vpop.eup %332  ;;  %v90_v31 = vmul.f32 %v88_v29, %v73_v1 }
  0xd9   :  { %v335_v32 = vpop.eup %334  ;;  %v154_v34 = vmul.f32 %v333_v30, %v139_v2 }
  0xda   :  { %92 = vst.msk [vmem:[#allocation2] sm:$0xff] %vm77_vm0, %v90_v31  ;;  %v89_v35 = vmul.f32 14.285714, %v335_v32 }
  0xdb   :  { %v158_v36 = vpack.c.bf16 %v154_v34, %v153_v33 }
  0xdc   :  { %v91_v37 = vmul.f32 %v89_v35, %v74_v6 }
  0xdd   :  { %v163_v38 = vsel %vm77_vm0, %v158_v36, 0  ;;  %v337_v54 = vpop.eup %336 }
  0xde   :  { %93 = vst.msk [vmem:[#allocation2 + $0x8] sm:$0xff] %vm77_vm0, %v91_v37  ;;  %309 = vmatpush3.bf16.xpose.msra.mxu0 %v163_v38  ;;  %v339_v55 = vpop.eup %338  ;;  %v108_v56 = vmul.f32 %v337_v54, %v526_v9 }
  0xdf   :  { %v109_v57 = vmul.f32 %v339_v55, %v524_v8  ;;  %v226_v8 = vld [vmem:[#allocation4] sm:$0x1] }
  0xe0   :  { %v110_v60 = vmul.f32 %v108_v56, %v90_v31 }
  0xe1   :  { %v155_v39 = vld [vmem:[#allocation2] sm:$0xff]  ;;  %v111_v63 = vmul.f32 %v109_v57, %v91_v37 }
  0xe2   :  { %v112_v1 = vsel %vm77_vm0, %v110_v60, 0.0 }
  0xe3   :  { %v115_v3 = vsel %vm77_vm0, %v111_v63, 0.0 }
  0xe5   :  { %v156_v40 = vld [vmem:[#allocation2 + $0x8] sm:$0xff] }
  0xe6   :  { %v157_v41 = vpack.c.bf16 %v156_v40, %v155_v39 }
  0xe8   :  { %311 = vmatmul.mubr.msk.bf16.vlgmr.msra.gmra.mrb[0].mxu0 %vm77_vm0, %v157_v41 }
 0x1bb   :  { %v199_v46 = vpop.f32.mrb[0].mxu0 }
 0x1bc   :  { %v304_v47 = vadd.f32 -14.285714, %v199_v46  ;;  %v312_v48 = vpop.f32.mrb[1].mxu0 }
 0x1bd   :  { %v202_v49 = vpop.f32.mrb[2].mxu0 }
 0x1be   :  { %v208_v50 = vmul.f32 1.442695, %v304_v47  ;;  %v305_v51 = vadd.f32 -14.285714, %v202_v49  ;;  %v313_v52 = vpop.f32.mrb[3].mxu0 }
 0x1c0   :  { %340 = vpow2.f32 %v208_v50  ;;  %v210_v53 = vmul.f32 1.442695, %v305_v51 }
 0x1c2   :  { %342 = vpow2.f32 %v210_v53 }
 0x1ca   :  { %v341_v58 = vpop.eup %340 }
 0x1cb   :  { %v215_v59 = vsel %vm214_vm4, %v341_v58, 0.0  ;;  %v118_v58 = vld [vmem:[#allocation5] sm:$0x1] }
 0x1cc   :  { %v343_v61 = vpop.eup %342  ;;  %216 = vadd.xlane.f32.xlu0 %v215_v59 }
 0x1cd   :  { %v218_v62 = vsel %vm214_vm4, %v343_v61, 0.0 }
 0x1ce   :  { %219 = vadd.xlane.f32.xlu1 %v218_v62  ;;  %v227_v0 = vadd.f32 %v218_v62, %v215_v59 }
 0x1d0   :  { %v228_v2 = vrot.slane %v227_v0, 4  ;;  %113 = vadd.xlane.f32.xlu0 %v112_v1 }
 0x1d2   :  { %v229_v4 = vadd.f32 %v228_v2, %v227_v0  ;;  %116 = vadd.xlane.f32.xlu1 %v115_v3 }
 0x1d4   :  { %v230_v5 = vrot.slane %v229_v4, 2 }
 0x1d6   :  { %v231_v6 = vadd.f32 %v230_v5, %v229_v4 }
 0x1d8   :  { %v232_v7 = vrot.slane %v231_v6, 1 }
 0x1da   :  { %v233_v9 = vadd.f32 %v232_v7, %v231_v6 }
 0x1dc   :  { %v234_v10 = vadd.f32 %v233_v9, %v226_v8 }
 0x1de   :  { %236 = vst.msk [vmem:[#allocation4] sm:$0x1] %vm63_vm2, %v234_v10 }
 0x1e5   :  { %v267_v11 = vld [vmem:[#allocation4] sm:$0x1] }
 0x1e6   :  { %344 = vlog2.f32 %v267_v11 }
 0x1f0   :  { %v345_v20 = vpop.eup %344 }
 0x1f1   :  { %v269_v25 = vmul.f32 0.6931472, %v345_v20 }
 0x1f3   :  { %v270_v28 = vsel %vm63_vm2, %v269_v25, 0.0 }
 0x259   :  { %v217_v13 = vpop.xlane.xlu0 %216 }
 0x25a   :  { %v221_v15 = vadd.f32 %v217_v13, %v212_v12 }
 0x25b   :  { %v220_v16 = vpop.xlane.xlu1 %219 }
 0x25c   :  { %224 = vst.msk [vmem:[#allocation3] sm:$0xff] %vm70_vm3, %v221_v15  ;;  %v222_v17 = vadd.f32 %v220_v16, %v213_v14 }
 0x25d   :  { %v114_v19 = vpop.xlane.xlu0 %113 }
 0x25e   :  { %225 = vst.msk [vmem:[#allocation3 + $0x8] sm:$0xff] %vm70_vm3, %v222_v17  ;;  %v119_v22 = vsel %vm70_vm3, %v114_v19, 0.0 }
 0x25f   :  { %v117_v21 = vpop.xlane.xlu1 %116 }
 0x260   :  { %v120_v23 = vsel %vm70_vm3, %v117_v21, 0.0 }
 0x261   :  { %v121_v24 = vadd.f32 %v120_v23, %v119_v22 }
 0x263   :  { %122 = vadd.xlane.f32.xlu0 %v121_v24  ;;  %v240_v26 = vld [vmem:[#allocation3] sm:$0xff] }
 0x264   :  { %346 = vlog2.f32 %v240_v26 }
 0x265   :  { %v241_v27 = vld [vmem:[#allocation3 + $0x8] sm:$0xff] }
 0x266   :  { %348 = vlog2.f32 %v241_v27 }
 0x267   :  { %271 = vadd.xlane.f32.xlu0 %v270_v28 }
 0x26e   :  { %v347_v29 = vpop.eup %346 }
 0x26f   :  { %v243_v30 = vmul.f32 0.6931472, %v347_v29 }
 0x270   :  { %v349_v31 = vpop.eup %348 }
 0x271   :  { %v245_v32 = vmul.f32 0.6931472, %v349_v31  ;;  %v246_v33 = vadd.f32 14.285714, %v243_v30 }
 0x273   :  { %v247_v34 = vadd.f32 14.285714, %v245_v32  ;;  %v249_v35 = vsel %vm70_vm3, %v246_v33, 0.0 }
 0x275   :  { %v250_v36 = vsel %vm70_vm3, %v247_v34, 0.0 }
 0x276   :  { %v251_v37 = vadd.f32 %v250_v36, %v249_v35 }
 0x278   :  { %252 = vadd.xlane.f32.xlu1 %v251_v37 }
 0x2f0   :  { %v123_v38 = vpop.xlane.xlu0 %122 }
 0x2f1   :  { %v124_v39 = vrot.slane %v123_v38, 4 }
 0x2f3   :  { %v125_v40 = vadd.f32 %v124_v39, %v123_v38 }
 0x2f4   :  { %v272_v44 = vpop.xlane.xlu0 %271 }
 0x2f5   :  { %v126_v41 = vrot.slane %v125_v40, 2  ;;  %v273_v46 = vrot.slane %v272_v44, 4 }
 0x2f7   :  { %v127_v42 = vadd.f32 %v126_v41, %v125_v40  ;;  %v274_v47 = vadd.f32 %v273_v46, %v272_v44 }
 0x2f9   :  { %v128_v43 = vrot.slane %v127_v42, 1  ;;  %v275_v48 = vrot.slane %v274_v47, 2 }
 0x2fb   :  { %v129_v45 = vadd.f32 %v128_v43, %v127_v42  ;;  %v276_v52 = vadd.f32 %v275_v48, %v274_v47 }
 0x2fd   :  { %314 = vpush %v129_v45  ;;  %v277_v55 = vrot.slane %v276_v52, 1 }
 0x2ff   :  { %v278_v57 = vadd.f32 %v277_v55, %v276_v52 }
 0x305   :  { %v253_v49 = vpop.xlane.xlu1 %252 }
 0x306   :  { %v254_v50 = vrot.slane %v253_v49, 4 }
 0x308   :  { %v255_v51 = vadd.f32 %v254_v50, %v253_v49 }
 0x30a   :  { %v256_v53 = vrot.slane %v255_v51, 2 }
 0x30c   :  { %v257_v54 = vadd.f32 %v256_v53, %v255_v51 }
 0x30e   :  { %v258_v18 = vrot.slane %v257_v54, 1 }
 0x310   :  { %v259_v56 = vadd.f32 %v258_v18, %v257_v54 }
 0x312   :  { %316 = vpush %v259_v56 }
 0x313   :  { %318 = vpush %v278_v57 }
 0x32e   :  { %s315_s2 = spop %314 }
 0x32f   :  { %v131_v59 = vstv %s315_s2 }
 0x330   :  { %v132_v60 = vmul.f32 2.0, %v131_v59 }
 0x332   :  { %v133_v61 = vsub.f32 %v118_v58, %v132_v60 }
 0x334   :  { %135 = vst.msk [vmem:[#allocation5] sm:$0x1] %vm65_vm5, %v133_v61 }
 0x33b   :  { %v248_v62 = vld [vmem:[#allocation5] sm:$0x1] }
 0x343   :  { %s317_s21 = spop %316 }
 0x344   :  { %v261_v63 = vstv %s317_s21  ;;  %s319_s22 = spop %318 }
 0x345   :  { %v262_v0 = vadd.f32 %v261_v63, %v248_v62  ;;  %s280_s23 = sadd.f32 228.57143, %s319_s22 }
 0x347   :  { %264 = vst.msk [vmem:[#allocation5] sm:$0x1] %vm65_vm5, %v262_v0  ;;  %v282_v2 = vstv %s280_s23 }
 0x34e   :  { %v281_v1 = vld [vmem:[#allocation5] sm:$0x1] }
 0x34f   :  { %v283_v3 = vadd.f32 %v282_v2, %v281_v1 }
 0x351   :  { %v284_v4 = vmul.f32 0.03125, %v283_v3 }
 0x353   :  { %286 = vst.msk [vmem:[#allocation12] sm:$0x1] %vm65_vm5, %v284_v4 }
 0x354   :  { %427 = shalt.err (!%p424_p0)
}
 0x355   :  { %s428_s30 = scalar_lea.hbm %s582_s3, 16 }
 0x356   :  { %p429_p1 = scmp.ne.s32.totalorder %s582_s3, %s428_s30  ;;  %p432_p2 = scmp.lt.u32.totalorder %s428_s30, %s582_s3 }
 0x358   :  { %p434_p3 = pnand %p432_p2, %p429_p1 }
 0x35a   :  { %437 = shalt.err (!%p434_p3)
}
 0x35b   :  { %296 = dma.vmem_to_hbm [thread:$0]  %s294_s25, 16, %s582_s3, [#allocation8]  }
 0x35c   :  { %442 = dma.done.wait [#allocation8], 16  }
 0x35d   :  { %443 = vsyncadd [#allocation8], 4294967280 }
 0x35e   :  { %300 = vsyncpa [#allocation7], 1 }
 0x35f   :  { %301 = vsyncpa [#allocation10], 1 }
 0x360   :  { %302 = vsyncpa [#allocation8], 1 }

</bundles_post_ra>
